<compile_context>
chip_gen: v7x
topology: tpu7x:2x2x1
jax: 0.10.0
libtpu: 0.0.40
codegen_flags: <defaults>
</compile_context>

<pallas_src>
import functools

import jax
import jax.numpy as jnp
from jax.experimental import pallas as pl
from jax.experimental.pallas import tpu as pltpu

_LANE = 128
_ROW = 32  # sublane alignment for tiled blocks (covers int8 (32,128) packing)


def _vmem_capacity_bytes():
    """Per-TensorCore VMEM capacity; conservative fallback if query fails."""
    try:
        info = pltpu.get_tpu_info()
        for attr in ("vmem_capacity_bytes", "vmem_size_bytes", "vmem_bytes"):
            v = getattr(info, attr, None)
            if v:
                return int(v)
    except Exception:
        pass
    return 64 * 1024 * 1024  # v7x per-TC VMEM (smallest current generation)


def _pow_alpha(x, alpha):
    """(1 - p) ** alpha without the exp/log lowering for the common cases."""
    a = float(alpha)
    if a == 1.0:
        return x
    if a == 0.0:
        return jnp.ones_like(x)
    if a.is_integer() and 0.0 < a <= 8.0:
        r = x
        for _ in range(int(a) - 1):
            r = r * x
        return r
    if a == 0.5:
        return jnp.sqrt(jnp.maximum(x, 0.0))
    # General alpha: clamp away tiny negatives introduced by the approximate
    # softmax reciprocal (p can marginally exceed 1) so log() never sees <= 0.
    xc = jnp.maximum(x, jnp.float32(1e-30))
    return jnp.exp(jnp.float32(a) * jnp.log(xc))


def _dice_kernel(pred_ref, label_ref, out_q_ref, out_qt_ref,
                 acc_q_ref, acc_qt_ref, *, alpha, s_valid, s_padded):
    # pred_ref : (1, C, TS, 128)  logits tile (native dtype) for sample n
    # label_ref: (1, TS, 128)     int8/int16/int32 class-id tile for sample n
    # out_*    : (1, 1, 1, 128)   f32 partial sums (written on last s step)
    # acc_*    : (acc_rows, 128)  f32 resident partial-sum accumulators
    sp = pl.program_id(1)
    s = pl.program_id(2)
    n_s = pl.num_programs(2)

    @pl.when(s == 0)
    def _():
        acc_q_ref[...] = jnp.zeros_like(acc_q_ref)
        acc_qt_ref[...] = jnp.zeros_like(acc_qt_ref)

    C = pred_ref.shape[1]
    lbl = label_ref[0].astype(jnp.int32)          # (TS, 128)
    TS, L = lbl.shape

    # --- softmax over the class axis: per-class (TS,128) slabs (VPU + EUP) ---
    # Re-read + upcast pred_ref[0, c] per use (VMEM loads are cheap) instead of
    # materializing a full (C, TS, 128) f32 array -> small live working set.
    m = pred_ref[0, 0].astype(jnp.float32)
    for c in range(1, C):
        m = jnp.maximum(m, pred_ref[0, c].astype(jnp.float32))
    es = [jnp.exp(pred_ref[0, c].astype(jnp.float32) - m) for c in range(C)]
    tot = es[0]
    for c in range(1, C):
        tot = tot + es[c]
    inv = pl.reciprocal(tot, approx=True)         # single EUP vrcp

    # --- q = (1-p)^alpha * p and its label-selected part, fused per class ---
    # TODO(synk): on v6e/v7x the post-softmax math could run in bf16 (packed
    # VALU) with f32 accumulation for ~2x on the saturating VALU slot.
    sum_q = None
    sum_qt = None
    for c in range(C):
        p = es[c] * inv
        q = _pow_alpha(1.0 - p, alpha) * p
        qt = jnp.where(lbl == c, q, 0.0)
        sum_q = q if sum_q is None else sum_q + q
        sum_qt = qt if sum_qt is None else sum_qt + qt

    acc_rows = acc_q_ref.shape[0]

    def _fold(v):
        # (TS, L) -> (acc_rows, L): pure vreg-slab adds (no cross-lane work).
        return jnp.sum(v.reshape(TS // acc_rows, acc_rows, L), axis=0)

    if s_padded == s_valid:
        # No spatial padding anywhere: no mask, ever.
        acc_q_ref[...] += _fold(sum_q)
        acc_qt_ref[...] += _fold(sum_qt)
    else:
        tile = sp * n_s + s                       # tile index on padded s axis
        needs_mask = (tile + 1) * (TS * L) > s_valid

        @pl.when(jnp.logical_not(needs_mask))
        def _():
            acc_q_ref[...] += _fold(sum_q)
            acc_qt_ref[...] += _fold(sum_qt)

        @pl.when(needs_mask)
        def _():
            sub = jax.lax.broadcasted_iota(jnp.int32, (TS, L), 0)
            ln = jax.lax.broadcasted_iota(jnp.int32, (TS, L), 1)
            pos = tile * (TS * L) + sub * L + ln
            valid = pos < s_valid
            acc_q_ref[...] += _fold(jnp.where(valid, sum_q, 0.0))
            acc_qt_ref[...] += _fold(jnp.where(valid, sum_qt, 0.0))

    @pl.when(s == n_s - 1)
    def _():
        out_q_ref[...] = jnp.full(out_q_ref.shape, jnp.sum(acc_q_ref[...]),
                                  dtype=out_q_ref.dtype)
        out_qt_ref[...] = jnp.full(out_qt_ref.shape, jnp.sum(acc_qt_ref[...]),
                                   dtype=out_qt_ref.dtype)


def dice_loss(y_pred, y_true, *, alpha=1.0, gamma=1.0, reduction="mean",
              max_rows_per_tile=None):
    """y_pred: [N, C, ...spatial] float logits. y_true: [N, ...spatial] ints in [0, C)."""
    N, C = int(y_pred.shape[0]), int(y_pred.shape[1])
    S = 1
    for d in y_pred.shape[2:]:
        S *= int(d)

    pred = y_pred.reshape(N, C, S)                 # stays in its native dtype
    pred_item = jnp.dtype(pred.dtype).itemsize

    S4 = -(-S // _LANE)                            # sublane rows of (rows, 128)

    # ---------------- generation-aware streaming-tile sizing -----------------
    vmem_phys = _vmem_capacity_bytes()
    # Per sublane-row (x128 lanes) footprint of one pipelined grid step:
    # double-buffered logits + double-buffered (narrow) labels + f32 working
    # set (~2C slabs of exp/upcast + a handful of temporaries).
    per_row = _LANE * (2 * C * pred_item + 2 * 1 + (2 * C + 8) * 4)
    budget = int(min(0.40 * vmem_phys, 56 * 1024 * 1024))
    ts_target = budget // per_row
    if max_rows_per_tile is not None:
        ts_target = min(ts_target, int(max_rows_per_tile))
    ts_target = max(_ROW, min(4096, (ts_target // _ROW) * _ROW))

    # Spatial split: feed the second TensorCore (v7x) when the batch cannot.
    n_splits = 2 if (N % 2 == 1 and S4 >= 64) else 1

    per_split_rows = -(-S4 // n_splits)
    if per_split_rows <= ts_target:
        n_s_per_split = 1
        if n_splits == 1:
            ts_sub = S4                            # full-dim block: any size ok
        else:
            ts_sub = -(-per_split_rows // _ROW) * _ROW
    else:
        ts_sub = ts_target                         # multiple of _ROW
        n_s_per_split = -(-per_split_rows // ts_sub)
    s4_pad = n_splits * n_s_per_split * ts_sub
    S_pad = s4_pad * _LANE

    # Labels: narrowest int that holds [0, C) *and* keeps packed-sublane
    # alignment for the chosen block (int8 packs (32,128), int16 (16,128)).
    if C <= 127 and ts_sub % 32 == 0:
        lbl_dtype = jnp.int8
    elif C <= 32767 and ts_sub % 16 == 0:
        lbl_dtype = jnp.int16
    else:
        lbl_dtype = jnp.int32
    labels = y_true.reshape(N, S).astype(lbl_dtype)

    if S_pad != S:
        pred = jnp.pad(pred, ((0, 0), (0, 0), (0, S_pad - S)))
        labels = jnp.pad(labels, ((0, 0), (0, S_pad - S)))
    pred = pred.reshape(N, C, s4_pad, _LANE)
    labels = labels.reshape(N, s4_pad, _LANE)

    acc_rows = 8 if ts_sub % 8 == 0 else ts_sub

    kernel = functools.partial(_dice_kernel, alpha=float(alpha),
                               s_valid=int(S), s_padded=int(S_pad))

    vmem_limit = int(min(0.75 * vmem_phys, 100 * 1024 * 1024))

    out_q, out_qt = pl.pallas_call(
        kernel,
        out_shape=(
            jax.ShapeDtypeStruct((N, n_splits, 1, _LANE), jnp.float32),
            jax.ShapeDtypeStruct((N, n_splits, 1, _LANE), jnp.float32),
        ),
        grid_spec=pltpu.PrefetchScalarGridSpec(
            num_scalar_prefetch=0,
            grid=(N, n_splits, n_s_per_split),
            in_specs=[
                pl.BlockSpec((1, C, ts_sub, _LANE),
                             lambda n, sp, s, _k=n_s_per_split: (n, 0, sp * _k + s, 0)),
                pl.BlockSpec((1, ts_sub, _LANE),
                             lambda n, sp, s, _k=n_s_per_split: (n, sp * _k + s, 0)),
            ],
            out_specs=[
                pl.BlockSpec((1, 1, 1, _LANE), lambda n, sp, s: (n, sp, 0, 0)),
                pl.BlockSpec((1, 1, 1, _LANE), lambda n, sp, s: (n, sp, 0, 0)),
            ],
            scratch_shapes=[
                pltpu.VMEM((acc_rows, _LANE), jnp.float32),  # sum(q) partials
                pltpu.VMEM((acc_rows, _LANE), jnp.float32),  # sum(q*one_hot) partials
            ],
        ),
        compiler_params=pltpu.CompilerParams(
            dimension_semantics=("parallel", "parallel", "arbitrary"),
            vmem_limit_bytes=vmem_limit,
        ),
    )(pred, labels)

    # Finalize in the wrapper: exact division, analytic sum(one_hot)=S term.
    sum_q = jnp.sum(out_q[:, :, 0, 0], axis=1)     # (N,)
    sum_qt = jnp.sum(out_qt[:, :, 0, 0], axis=1)   # (N,)
    g = jnp.float32(gamma)
    num = 2.0 * sum_qt + g
    den = sum_q + jnp.float32(S) + g
    per_sample = 1.0 - num / den
    if reduction == "mean":
        return jnp.mean(per_sample)
    elif reduction == "sum":
        return jnp.sum(per_sample)
    else:
        return per_sample


def _dice_loss_ref(y_pred, y_true, *, alpha=1.0, gamma=1.0, reduction="mean"):
    """Pure-JAX reference mirroring the PyTorch module."""
    N, C = y_pred.shape[0], y_pred.shape[1]
    p = jax.nn.softmax(y_pred.astype(jnp.float32), axis=1)
    t = jax.nn.one_hot(y_true, C, dtype=jnp.float32)           # [N, ..., C]
    t = jnp.moveaxis(t, -1, 1)                                  # [N, C, ...]
    p = p.reshape(N, -1)
    t = t.reshape(N, -1)
    num = jnp.sum(2.0 * jnp.power(1.0 - p, alpha) * p * t, axis=1) + gamma
    den = jnp.sum(jnp.power(1.0 - p, alpha) * p + t, axis=1) + gamma
    loss = 1.0 - num / den
    if reduction == "mean":
        return jnp.mean(loss)
    elif reduction == "sum":
        return jnp.sum(loss)
    return loss


if __name__ == "__main__":
    key = jax.random.PRNGKey(0)
    k1, k2, k3, k4 = jax.random.split(key, 4)

    # --- check 1: module-default config, f32 logits, even batch -------------
    N, C, H, W = 2, 4, 16, 16
    y_pred = jax.random.normal(k1, (N, C, H, W), dtype=jnp.float32)
    y_true = jax.random.randint(k2, (N, H, W), 0, C, dtype=jnp.int32)
    loss = jax.block_until_ready(
        dice_loss(y_pred, y_true, alpha=1.0, gamma=1.0, reduction="mean"))
    ref = _dice_loss_ref(y_pred, y_true, alpha=1.0, gamma=1.0, reduction="mean")
    # approximate reciprocal in the in-kernel softmax loosens agreement slightly
    assert jnp.allclose(loss, ref, rtol=3e-3, atol=3e-3), (loss, ref)

    # --- check 2: bf16 logits, int8 labels, odd batch (spatial split across
    #     TensorCores), multi-tile spatial reduction + padding mask ----------
    N2, C2, H2, W2 = 1, 3, 96, 96
    y_pred2 = jax.random.normal(k3, (N2, C2, H2, W2), dtype=jnp.bfloat16)
    y_true2 = jax.random.randint(k4, (N2, H2, W2), 0, C2, dtype=jnp.int32)
    loss2 = jax.block_until_ready(
        dice_loss(y_pred2, y_true2, alpha=2.0, gamma=1.0, reduction="none",
                  max_rows_per_tile=32))
    ref2 = _dice_loss_ref(y_pred2, y_true2, alpha=2.0, gamma=1.0, reduction="none")
    assert jnp.allclose(loss2, ref2, rtol=3e-3, atol=3e-3), (loss2, ref2)

    print("KERNEL_OK")
</pallas_src>

<mosaic_0001>
module attributes {stable_mosaic.version = 11 : i64} {
  func.func @_dice_kernel(%arg0: i32, %arg1: i32, %arg2: i32, %arg3: memref<1x4x2x128xf32, #tpu.memory_space<vmem>>, %arg4: memref<1x2x128xi32, #tpu.memory_space<vmem>>, %arg5: memref<1x1x1x128xf32, #tpu.memory_space<vmem>>, %arg6: memref<1x1x1x128xf32, #tpu.memory_space<vmem>>, %arg7: memref<2x128xf32, #tpu.memory_space<vmem>>, %arg8: memref<2x128xf32, #tpu.memory_space<vmem>>) attributes {dimension_semantics = [#tpu.dimension_semantics<parallel>, #tpu.dimension_semantics<parallel>, #tpu.dimension_semantics<arbitrary>], iteration_bounds = array<i64: 2, 1, 1>, scalar_prefetch = 0 : i64, scratch_operands = 2 : i64, tpu.core_type = #tpu.core_type<tc>, window_params = [{transform_indices = @transform_0, window_bounds = array<i64: 1, 4, 2, 128>}, {transform_indices = @transform_1, window_bounds = array<i64: 1, 2, 128>}, {transform_indices = @transform_2, window_bounds = array<i64: 1, 1, 1, 128>}, {transform_indices = @transform_3, window_bounds = array<i64: 1, 1, 1, 128>}]} {
    %c0_i32 = arith.constant 0 : i32
    %0 = arith.cmpi eq, %arg2, %c0_i32 : i32
    %1 = arith.extui %0 : i1 to i32
    %c0_i32_0 = arith.constant 0 : i32
    %2 = arith.cmpi ne, %1, %c0_i32_0 : i32
    scf.if %2 {
      %cst_52 = arith.constant 0.000000e+00 : f32
      %87 = vector.broadcast %cst_52 : f32 to vector<2x128xf32>
      %c0_53 = arith.constant 0 : index
      %c0_54 = arith.constant 0 : index
      %88 = vector.load %arg7[%c0_53, %c0_54] : memref<2x128xf32, #tpu.memory_space<vmem>>, vector<2x128xf32>
      tpu.vector_store %arg7[%c0_53, %c0_54], %87 {strides = array<i32>} : memref<2x128xf32, #tpu.memory_space<vmem>>, vector<2x128xf32>,
      %cst_55 = arith.constant 0.000000e+00 : f32
      %89 = vector.broadcast %cst_55 : f32 to vector<2x128xf32>
      %c0_56 = arith.constant 0 : index
      %c0_57 = arith.constant 0 : index
      %90 = vector.load %arg8[%c0_56, %c0_57] : memref<2x128xf32, #tpu.memory_space<vmem>>, vector<2x128xf32>
      tpu.vector_store %arg8[%c0_56, %c0_57], %89 {strides = array<i32>} : memref<2x128xf32, #tpu.memory_space<vmem>>, vector<2x128xf32>,
    } else {
    }
    %c0 = arith.constant 0 : index
    %c0_1 = arith.constant 0 : index
    %c0_2 = arith.constant 0 : index
    %3 = vector.load %arg4[%c0, %c0_1, %c0_2] : memref<1x2x128xi32, #tpu.memory_space<vmem>>, vector<1x2x128xi32>
    %4 = vector.shape_cast %3 : vector<1x2x128xi32> to vector<2x128xi32>
    %c0_3 = arith.constant 0 : index
    %c0_4 = arith.constant 0 : index
    %c0_5 = arith.constant 0 : index
    %c0_6 = arith.constant 0 : index
    %5 = vector.load %arg3[%c0_3, %c0_4, %c0_5, %c0_6] : memref<1x4x2x128xf32, #tpu.memory_space<vmem>>, vector<1x1x2x128xf32>
    %6 = vector.shape_cast %5 : vector<1x1x2x128xf32> to vector<2x128xf32>
    %c0_7 = arith.constant 0 : index
    %c1 = arith.constant 1 : index
    %c0_8 = arith.constant 0 : index
    %c0_9 = arith.constant 0 : index
    %7 = vector.load %arg3[%c0_7, %c1, %c0_8, %c0_9] : memref<1x4x2x128xf32, #tpu.memory_space<vmem>>, vector<1x1x2x128xf32>
    %8 = vector.shape_cast %7 : vector<1x1x2x128xf32> to vector<2x128xf32>
    %9 = arith.maximumf %6, %8 : vector<2x128xf32>
    %c0_10 = arith.constant 0 : index
    %c2 = arith.constant 2 : index
    %c0_11 = arith.constant 0 : index
    %c0_12 = arith.constant 0 : index
    %10 = vector.load %arg3[%c0_10, %c2, %c0_11, %c0_12] : memref<1x4x2x128xf32, #tpu.memory_space<vmem>>, vector<1x1x2x128xf32>
    %11 = vector.shape_cast %10 : vector<1x1x2x128xf32> to vector<2x128xf32>
    %12 = arith.maximumf %9, %11 : vector<2x128xf32>
    %c0_13 = arith.constant 0 : index
    %c3 = arith.constant 3 : index
    %c0_14 = arith.constant 0 : index
    %c0_15 = arith.constant 0 : index
    %13 = vector.load %arg3[%c0_13, %c3, %c0_14, %c0_15] : memref<1x4x2x128xf32, #tpu.memory_space<vmem>>, vector<1x1x2x128xf32>
    %14 = vector.shape_cast %13 : vector<1x1x2x128xf32> to vector<2x128xf32>
    %15 = arith.maximumf %12, %14 : vector<2x128xf32>
    %c0_16 = arith.constant 0 : index
    %c0_17 = arith.constant 0 : index
    %c0_18 = arith.constant 0 : index
    %c0_19 = arith.constant 0 : index
    %16 = vector.load %arg3[%c0_16, %c0_17, %c0_18, %c0_19] : memref<1x4x2x128xf32, #tpu.memory_space<vmem>>, vector<1x1x2x128xf32>
    %17 = vector.shape_cast %16 : vector<1x1x2x128xf32> to vector<2x128xf32>
    %18 = arith.subf %17, %15 : vector<2x128xf32>
    %19 = math.exp %18 : vector<2x128xf32>
    %c0_20 = arith.constant 0 : index
    %c1_21 = arith.constant 1 : index
    %c0_22 = arith.constant 0 : index
    %c0_23 = arith.constant 0 : index
    %20 = vector.load %arg3[%c0_20, %c1_21, %c0_22, %c0_23] : memref<1x4x2x128xf32, #tpu.memory_space<vmem>>, vector<1x1x2x128xf32>
    %21 = vector.shape_cast %20 : vector<1x1x2x128xf32> to vector<2x128xf32>
    %22 = arith.subf %21, %15 : vector<2x128xf32>
    %23 = math.exp %22 : vector<2x128xf32>
    %c0_24 = arith.constant 0 : index
    %c2_25 = arith.constant 2 : index
    %c0_26 = arith.constant 0 : index
    %c0_27 = arith.constant 0 : index
    %24 = vector.load %arg3[%c0_24, %c2_25, %c0_26, %c0_27] : memref<1x4x2x128xf32, #tpu.memory_space<vmem>>, vector<1x1x2x128xf32>
    %25 = vector.shape_cast %24 : vector<1x1x2x128xf32> to vector<2x128xf32>
    %26 = arith.subf %25, %15 : vector<2x128xf32>
    %27 = math.exp %26 : vector<2x128xf32>
    %c0_28 = arith.constant 0 : index
    %c3_29 = arith.constant 3 : index
    %c0_30 = arith.constant 0 : index
    %c0_31 = arith.constant 0 : index
    %28 = vector.load %arg3[%c0_28, %c3_29, %c0_30, %c0_31] : memref<1x4x2x128xf32, #tpu.memory_space<vmem>>, vector<1x1x2x128xf32>
    %29 = vector.shape_cast %28 : vector<1x1x2x128xf32> to vector<2x128xf32>
    %30 = arith.subf %29, %15 : vector<2x128xf32>
    %31 = math.exp %30 : vector<2x128xf32>
    %32 = arith.addf %19, %23 : vector<2x128xf32>
    %33 = arith.addf %32, %27 : vector<2x128xf32>
    %34 = arith.addf %33, %31 : vector<2x128xf32>
    %35 = tpu.reciprocal %34 {approx = true} : vector<2x128xf32> -> vector<2x128xf32>
    %36 = arith.mulf %19, %35 : vector<2x128xf32>
    %cst = arith.constant 1.000000e+00 : f32
    %37 = vector.broadcast %cst : f32 to vector<2x128xf32>
    %38 = arith.subf %37, %36 : vector<2x128xf32>
    %39 = arith.mulf %38, %36 : vector<2x128xf32>
    %c0_i32_32 = arith.constant 0 : i32
    %40 = vector.broadcast %c0_i32_32 : i32 to vector<2x128xi32>
    %41 = arith.cmpi eq, %4, %40 : vector<2x128xi32>
    %cst_33 = arith.constant 0.000000e+00 : f32
    %42 = vector.broadcast %cst_33 : f32 to vector<2x128xf32>
    %43 = arith.select %41, %39, %42 : vector<2x128xi1>, vector<2x128xf32>
    %44 = arith.mulf %23, %35 : vector<2x128xf32>
    %cst_34 = arith.constant 1.000000e+00 : f32
    %45 = vector.broadcast %cst_34 : f32 to vector<2x128xf32>
    %46 = arith.subf %45, %44 : vector<2x128xf32>
    %47 = arith.mulf %46, %44 : vector<2x128xf32>
    %c1_i32 = arith.constant 1 : i32
    %48 = vector.broadcast %c1_i32 : i32 to vector<2x128xi32>
    %49 = arith.cmpi eq, %4, %48 : vector<2x128xi32>
    %cst_35 = arith.constant 0.000000e+00 : f32
    %50 = vector.broadcast %cst_35 : f32 to vector<2x128xf32>
    %51 = arith.select %49, %47, %50 : vector<2x128xi1>, vector<2x128xf32>
    %52 = arith.addf %39, %47 : vector<2x128xf32>
    %53 = arith.addf %43, %51 : vector<2x128xf32>
    %54 = arith.mulf %27, %35 : vector<2x128xf32>
    %cst_36 = arith.constant 1.000000e+00 : f32
    %55 = vector.broadcast %cst_36 : f32 to vector<2x128xf32>
    %56 = arith.subf %55, %54 : vector<2x128xf32>
    %57 = arith.mulf %56, %54 : vector<2x128xf32>
    %c2_i32 = arith.constant 2 : i32
    %58 = vector.broadcast %c2_i32 : i32 to vector<2x128xi32>
    %59 = arith.cmpi eq, %4, %58 : vector<2x128xi32>
    %cst_37 = arith.constant 0.000000e+00 : f32
    %60 = vector.broadcast %cst_37 : f32 to vector<2x128xf32>
    %61 = arith.select %59, %57, %60 : vector<2x128xi1>, vector<2x128xf32>
    %62 = arith.addf %52, %57 : vector<2x128xf32>
    %63 = arith.addf %53, %61 : vector<2x128xf32>
    %64 = arith.mulf %31, %35 : vector<2x128xf32>
    %cst_38 = arith.constant 1.000000e+00 : f32
    %65 = vector.broadcast %cst_38 : f32 to vector<2x128xf32>
    %66 = arith.subf %65, %64 : vector<2x128xf32>
    %67 = arith.mulf %66, %64 : vector<2x128xf32>
    %c3_i32 = arith.constant 3 : i32
    %68 = vector.broadcast %c3_i32 : i32 to vector<2x128xi32>
    %69 = arith.cmpi eq, %4, %68 : vector<2x128xi32>
    %cst_39 = arith.constant 0.000000e+00 : f32
    %70 = vector.broadcast %cst_39 : f32 to vector<2x128xf32>
    %71 = arith.select %69, %67, %70 : vector<2x128xi1>, vector<2x128xf32>
    %72 = arith.addf %62, %67 : vector<2x128xf32>
    %73 = arith.addf %63, %71 : vector<2x128xf32>
    %c0_40 = arith.constant 0 : index
    %c0_41 = arith.constant 0 : index
    %74 = vector.load %arg7[%c0_40, %c0_41] : memref<2x128xf32, #tpu.memory_space<vmem>>, vector<2x128xf32>
    %75 = vector.shape_cast %72 : vector<2x128xf32> to vector<1x2x128xf32>
    %cst_42 = arith.constant dense<0.000000e+00> : vector<2x128xf32>
    %76 = vector.multi_reduction <add>, %75, %cst_42 [0] : vector<1x2x128xf32> to vector<2x128xf32>
    %77 = arith.addf %74, %76 : vector<2x128xf32>
    %c0_43 = arith.constant 0 : index
    %c0_44 = arith.constant 0 : index
    %78 = vector.load %arg7[%c0_43, %c0_44] : memref<2x128xf32, #tpu.memory_space<vmem>>, vector<2x128xf32>
    tpu.vector_store %arg7[%c0_43, %c0_44], %77 {strides = array<i32>} : memref<2x128xf32, #tpu.memory_space<vmem>>, vector<2x128xf32>,
    %c0_45 = arith.constant 0 : index
    %c0_46 = arith.constant 0 : index
    %79 = vector.load %arg8[%c0_45, %c0_46] : memref<2x128xf32, #tpu.memory_space<vmem>>, vector<2x128xf32>
    %80 = vector.shape_cast %73 : vector<2x128xf32> to vector<1x2x128xf32>
    %cst_47 = arith.constant dense<0.000000e+00> : vector<2x128xf32>
    %81 = vector.multi_reduction <add>, %80, %cst_47 [0] : vector<1x2x128xf32> to vector<2x128xf32>
    %82 = arith.addf %79, %81 : vector<2x128xf32>
    %c0_48 = arith.constant 0 : index
    %c0_49 = arith.constant 0 : index
    %83 = vector.load %arg8[%c0_48, %c0_49] : memref<2x128xf32, #tpu.memory_space<vmem>>, vector<2x128xf32>
    tpu.vector_store %arg8[%c0_48, %c0_49], %82 {strides = array<i32>} : memref<2x128xf32, #tpu.memory_space<vmem>>, vector<2x128xf32>,
    %c0_i32_50 = arith.constant 0 : i32
    %84 = arith.cmpi eq, %arg2, %c0_i32_50 : i32
    %85 = arith.extui %84 : i1 to i32
    %c0_i32_51 = arith.constant 0 : i32
    %86 = arith.cmpi ne, %85, %c0_i32_51 : i32
    scf.if %86 {
      %c0_52 = arith.constant 0 : index
      %c0_53 = arith.constant 0 : index
      %87 = vector.load %arg7[%c0_52, %c0_53] : memref<2x128xf32, #tpu.memory_space<vmem>>, vector<2x128xf32>
      %88 = vector.shape_cast %87 : vector<2x128xf32> to vector<1x2x128xf32>
      %cst_54 = arith.constant dense<0.000000e+00> : vector<1xf32>
      %89 = vector.multi_reduction <add>, %88, %cst_54 [1, 2] : vector<1x2x128xf32> to vector<1xf32>
      %90 = vector.shape_cast %89 : vector<1xf32> to vector<1x1x1xf32>
      %91 = vector.extract %90[0, 0, 0] : f32 from vector<1x1x1xf32>
      %92 = vector.broadcast %91 : f32 to vector<1x1x1x128xf32>
      %c0_55 = arith.constant 0 : index
      %c0_56 = arith.constant 0 : index
      %c0_57 = arith.constant 0 : index
      %c0_58 = arith.constant 0 : index
      %93 = vector.load %arg5[%c0_55, %c0_56, %c0_57, %c0_58] : memref<1x1x1x128xf32, #tpu.memory_space<vmem>>, vector<1x1x1x128xf32>
      tpu.vector_store %arg5[%c0_55, %c0_56, %c0_57, %c0_58], %92 {strides = array<i32>} : memref<1x1x1x128xf32, #tpu.memory_space<vmem>>, vector<1x1x1x128xf32>,
      %c0_59 = arith.constant 0 : index
      %c0_60 = arith.constant 0 : index
      %94 = vector.load %arg8[%c0_59, %c0_60] : memref<2x128xf32, #tpu.memory_space<vmem>>, vector<2x128xf32>
      %95 = vector.shape_cast %94 : vector<2x128xf32> to vector<1x2x128xf32>
      %cst_61 = arith.constant dense<0.000000e+00> : vector<1xf32>
      %96 = vector.multi_reduction <add>, %95, %cst_61 [1, 2] : vector<1x2x128xf32> to vector<1xf32>
      %97 = vector.shape_cast %96 : vector<1xf32> to vector<1x1x1xf32>
      %98 = vector.extract %97[0, 0, 0] : f32 from vector<1x1x1xf32>
      %99 = vector.broadcast %98 : f32 to vector<1x1x1x128xf32>
      %c0_62 = arith.constant 0 : index
      %c0_63 = arith.constant 0 : index
      %c0_64 = arith.constant 0 : index
      %c0_65 = arith.constant 0 : index
      %100 = vector.load %arg6[%c0_62, %c0_63, %c0_64, %c0_65] : memref<1x1x1x128xf32, #tpu.memory_space<vmem>>, vector<1x1x1x128xf32>
      tpu.vector_store %arg6[%c0_62, %c0_63, %c0_64, %c0_65], %99 {strides = array<i32>} : memref<1x1x1x128xf32, #tpu.memory_space<vmem>>, vector<1x1x1x128xf32>,
    } else {
    }
    return
  }
  func.func @transform_0(%arg0: i32, %arg1: i32, %arg2: i32) -> (i32, i32, i32, i32) {
    %c1_i32 = arith.constant 1 : i32
    %0 = arith.muli %arg1, %c1_i32 : i32
    %1 = arith.addi %0, %arg2 : i32
    %c0_i32 = arith.constant 0 : i32
    %c0_i32_0 = arith.constant 0 : i32
    %c0_i32_1 = arith.constant 0 : i32
    return %arg0, %c0_i32, %1, %c0_i32_0 : i32, i32, i32, i32
  }
  func.func @transform_1(%arg0: i32, %arg1: i32, %arg2: i32) -> (i32, i32, i32) {
    %c1_i32 = arith.constant 1 : i32
    %0 = arith.muli %arg1, %c1_i32 : i32
    %1 = arith.addi %0, %arg2 : i32
    %c0_i32 = arith.constant 0 : i32
    %c0_i32_0 = arith.constant 0 : i32
    return %arg0, %1, %c0_i32 : i32, i32, i32
  }
  func.func @transform_2(%arg0: i32, %arg1: i32, %arg2: i32) -> (i32, i32, i32, i32) {
    %c0_i32 = arith.constant 0 : i32
    %c0_i32_0 = arith.constant 0 : i32
    %c0_i32_1 = arith.constant 0 : i32
    return %arg0, %arg1, %c0_i32, %c0_i32_0 : i32, i32, i32, i32
  }
  func.func @transform_3(%arg0: i32, %arg1: i32, %arg2: i32) -> (i32, i32, i32, i32) {
    %c0_i32 = arith.constant 0 : i32
    %c0_i32_0 = arith.constant 0 : i32
    %c0_i32_1 = arith.constant 0 : i32
    return %arg0, %arg1, %c0_i32, %c0_i32_0 : i32, i32, i32, i32
  }
}

</mosaic_0001>

<bundles_post_ra>
// kernel: tpu_custom_call.1
= control target key start
LH: loop header
LB: loop body
LE: loop exit
PB: predicated region body
PF: predicated region fallthrough
CT: control target
= control target key end

     0   :  { %9 = vsyncpa [#allocation5], 0  ;;  %s1109_s0 = inlined_call_operand.hbm [shape: f32[2,4,2,128], index: 0, kind: input, shape index: {}]   ;;  %s1110_s1 = inlined_call_operand.hbm [shape: s32[2,2,128], index: 1, kind: input, shape index: {}]   ;;  %s1111_s2 = inlined_call_operand.hbm [shape: f32[2,1,1,128], index: 2, kind: output, shape index: {0}]   ;;  %s1112_s3 = inlined_call_operand.hbm [shape: f32[2,1,1,128], index: 3, kind: output, shape index: {1}]  }
   0x1   :  { %11 = vsyncpa [#allocation5 + $0x1], 0 }
   0x2   :  { %12 = vsyncpa [#allocation8], 0 }
   0x3   :  { %14 = vsyncpa [#allocation8 + $0x1], 0 }
   0x4   :  { %15 = vsyncpa [#allocation6], 0 }
   0x5   :  { %17 = vsyncpa [#allocation6 + $0x1], 0 }
   0x6   :  { %18 = vsyncpa [#allocation11], 0 }
   0x7   :  { %20 = vsyncpa [#allocation11 + $0x1], 0  ;;  %s852_s12 = smov 0   ;;  %s854_s13 = smov 0  }
   0x8   :  { %s856_s14 = smov 0   ;;  %s858_s15 = smov 0  }
   0x9   :  { %s860_s16 = smov 0   ;;  %s862_s17 = smov 0  }
   0xa LB: > { %s536_s18 = sadd.s32 4294967295, %s823_s17   ;;  %s537_s19 = sadd.s32 4294967294, %s823_s17   ;;  %s823_s17 = sphi %s862_s17, %s26_s17   ;;  %s819_s16 = sphi %s860_s16, %s1131_s16   ;;  %s815_s15 = sphi %s858_s15, %s1130_s15   ;;  %s811_s14 = sphi %s856_s14, %s1129_s14   ;;  %s807_s13 = sphi %s854_s13, %s1128_s13   ;;  %s803_s12 = sphi %s852_s12, %s1127_s12  }
   0xb   : > { %s45_s20 = sadd.s32 1, %s819_s16  ;;  %s56_s21 = sadd.s32 1, %s811_s14 }
   0xc   : > { %p47_p0 = scmp.ge.s32.totalorder %s45_s20, 2  ;;  %p63_p1 = scmp.ne.s32.totalorder %s811_s14, %s807_s13 }
   0xd   : > { %p64_p2 = scmp.eq.s32.totalorder %s823_s17, 0  ;;  %p69_p3 = scmp.ne.s32.totalorder %s807_s13, %s803_s12 }
   0xe   : > { %s1133_s20 = smov (%p47_p0, %s45_s20), 0  ;;  %p70_p5 = scmp.eq.s32.totalorder %s536_s18, 0 }
   0xf   : > { %p893_p4 = por %p64_p2, %p63_p1  ;;  %s51_s23 = ssub.s32 %s819_s16, %s1133_s20 }
  0x10   : > { %p125_p6 = scmp.eq.s32.totalorder %s536_s18, 1  ;;  %p54_p7 = scmp.eq.s32.totalorder %s51_s23, 0 }
  0x11   : > { %p899_p8 = por %p70_p5, %p69_p3  ;;  %p131_p10 = scmp.eq.s32.totalorder %s537_s19, 1 }
  0x12   : > { %p903_p9 = por %p125_p6, %p63_p1  ;;  %p582_p13 = scmp.lt.s32.totalorder %s823_s17, 2 }
  0x13   : > { %s1116_s24 = scalar_select %p899_p8, 1, 0 }
  0x14   : > { %s1117_s25 = scalar_select %p903_p9, 1, 0 }
  0x15   : > { %s908_s26 = scalar_select %p54_p7, %s811_s14, %s56_s21  }
  0x16   : > { %p910_p11 = por %p131_p10, %p69_p3  ;;  %s917_s28 = sand.u32 1, %s811_s14  }
  0x17   : > { %s540_s29 = sshll.u32 %s917_s28, 3  ;;  %s555_s30 = sshll.u32 %s819_s16, 7 }
  0x18   : > { %s1118_s27 = scalar_select %p910_p11, 1, 0 }
  0x19   : > { %s924_s6 = scalar_lea.hbm %s1109_s0, %s555_s30  ;;  %s183_s7 = scalar_lea.vmem [#allocation4], %s540_s29 }
  0x1a   : > { %s192_s8 = sshll.u32 %s183_s7, 4  ;;  %p930_p0 = pnand %p582_p13, %p893_p4  ;;  %s926_s8 = int_to_ptr.vmem [resolvable:$true] %s192_s8 }
  0x1b   : > { %s180_s10 = scalar_lea.sflag [#allocation5], %s917_s28  ;;  %s645_s11 = scalar_lea.hbm %s924_s6, 128 }
  0x1c   : > { %p646_p2 = scmp.ne.s32.totalorder %s924_s6, %s645_s11  ;;  %p647_p3 = pneg %p930_p0 }
  0x1d   : > { %s650_s21 = scalar_lea.hbm %s1109_s0, 256  ;;  %p651_p4 = scmp.lt.u32.totalorder %s924_s6, %s1109_s0 }
  0x1e   : > { %p648_p5 = pnand %p647_p3, %p646_p2  ;;  %p652_p7 = scmp.lt.u32.totalorder %s650_s21, %s645_s11 }
  0x1f   : > { %p654_p13 = scmp.lt.u32.totalorder %s645_s11, %s924_s6 }
  0x20   : > { %p649_p6 = pneg %p648_p5  ;;  %p653_p10 = por %p652_p7, %p651_p4 }
  0x22   : > { %p655_p12 = por %p654_p13, %p653_p10 }
  0x24   : > { %p656_p1 = pnand %p655_p12, %p649_p6 }
  0x26   : > { %659 = shalt.err (!%p656_p1)
}
  0x27   : > { %s660_s29 = scalar_lea.vmem %s926_s8, 128  ;;  %s825_s30 = smov [#allocation4]  }
  0x28   : > { %p661_p2 = scmp.ne.s32.totalorder %s926_s8, %s660_s29  ;;  %s665_s4 = sshll.u32 %s825_s30, 4  ;;  %s666_s4 = int_to_ptr.vmem [resolvable:$false] %s665_s4 }
  0x29   : > { %s667_s5 = scalar_lea.vmem %s666_s4, 256  ;;  %p668_p9 = scmp.lt.s32.totalorder %s926_s8, %s666_s4 }
  0x2a   : > { %p663_p5 = pnand %p661_p2, %p647_p3  ;;  %p669_p4 = scmp.lt.s32.totalorder %s667_s5, %s660_s29 }
  0x2c   : > { %p664_p11 = pneg %p663_p5  ;;  %p670_p7 = por %p669_p4, %p668_p9 }
  0x2e   : > { %p671_p10 = pnand %p670_p7, %p664_p11 }
  0x30   : > { %674 = shalt.err (!%p671_p10)
}
  0x31   : > { %s826_s7 = smov 32   ;;  %s827_s11 = smov 2  }
  0x32   : > { %571 = dma.hbm_to_vmem [thread:$0]  (!%p930_p0), %s924_s6, 128, %s926_s8, %s180_s10, %s826_s7, %s826_s7, %s827_s11  }
  0x33   : > { %p220_p12 = scmp.lt.s32.totalorder %s823_s17, 3  ;;  %s543_s18 = sshll.u32 %s917_s28, 1 }
  0x34   : > { %s544_s19 = sshll.u32 %s819_s16, 5  ;;  %p1120_p9 = scmp.ge.s32.totalorder %s823_s17, 1 }
  0x35   : > { %s975_s29 = scalar_lea.hbm %s1110_s1, %s544_s19  ;;  %s206_s30 = scalar_lea.vmem [#allocation7], %s543_s18 }
  0x36   : > { %p968_p11 = pnand %p1120_p9, %p220_p12  ;;  %s215_s4 = sshll.u32 %s206_s30, 4  ;;  %s216_s4 = int_to_ptr.vmem [resolvable:$true] %s215_s4 }
  0x37   : > { %s203_s6 = scalar_lea.sflag [#allocation8], %s917_s28  ;;  %s675_s8 = scalar_lea.hbm %s975_s29, 32 }
  0x38   : > { %s1121_s21 = scalar_select %p968_p11, 1, 0 }
  0x39   : > { %p676_p1 = scmp.ne.s32.totalorder %s975_s29, %s675_s8  ;;  %s680_s7 = scalar_lea.hbm %s1110_s1, 64 }
  0x3a   : > { %p681_p2 = scmp.lt.u32.totalorder %s975_s29, %s1110_s1  ;;  %p682_p5 = scmp.lt.u32.totalorder %s680_s7, %s675_s8 }
  0x3b   : > { %p678_p6 = pnand %p676_p1, %p647_p3  ;;  %p684_p7 = scmp.lt.u32.totalorder %s675_s8, %s975_s29 }
  0x3c   : > { %p683_p4 = por %p682_p5, %p681_p2 }
  0x3d   : > { %p679_p13 = pneg %p678_p6 }
  0x3e   : > { %p685_p10 = por %p684_p7, %p683_p4 }
  0x40   : > { %p686_p12 = pnand %p685_p10, %p679_p13 }
  0x42   : > { %689 = shalt.err (!%p686_p12)
}
  0x43   : > { %s690_s28 = scalar_lea.vmem %s216_s4, 32  ;;  %s828_s18 = smov [#allocation7]  }
  0x44   : > { %p691_p9 = scmp.ne.s32.totalorder %s216_s4, %s690_s28  ;;  %s695_s22 = sshll.u32 %s828_s18, 4  ;;  %s696_s22 = int_to_ptr.vmem [resolvable:$false] %s695_s22 }
  0x45   : > { %s697_s23 = scalar_lea.vmem %s696_s22, 64  ;;  %p698_p8 = scmp.lt.s32.totalorder %s216_s4, %s696_s22 }
  0x46   : > { %p693_p1 = pnand %p691_p9, %p647_p3  ;;  %p699_p11 = scmp.lt.s32.totalorder %s697_s23, %s690_s28 }
  0x48   : > { %p694_p6 = pneg %p693_p1  ;;  %p700_p2 = por %p699_p11, %p698_p8 }
  0x4a   : > { %p701_p5 = pnand %p700_p2, %p694_p6 }
  0x4c   : > { %704 = shalt.err (!%p701_p5)
}
  0x4d   : > { %574 = dma.hbm_to_vmem [thread:$0]  (!%p930_p0), %s975_s29, 32, %s216_s4, %s203_s6  }
  0x4e   : > { %p1122_p13 = scmp.ne.s32.totalorder %s1121_s21, 0 }
  0x4f   : > { %s1000_s30 = sand.u32 (!%p1122_p13), 1, %s807_s13   ;;  %p1123_p3 = scmp.ne.s32.totalorder (!%p1122_p13), %s1116_s24, 0 }
  0x50   : > { %224 = sbr.rel (%p1122_p13) target bundleno = 397 (0x18d), region = 28  ;;  %s546_s8 = sshll.u32 (!%p1122_p13), %s1000_s30, 3 }
  0x51   : > { %s227_s10 = scalar_lea.sflag (!%p1122_p13), [#allocation5], %s1000_s30  ;;  %s230_s5 = scalar_lea.vmem (!%p1122_p13), [#allocation4], %s546_s8 }
  0x57   : > { %786 = dma.done.wait (%p1123_p3), %s227_s10, 128  }
  0x58   : > { %788 = vsyncadd (%p1123_p3), %s227_s10, 4294967168  ;;  %s547_s9 = sshll.u32 %s1000_s30, 1  ;;  %s236_s21 = scalar_lea.sflag [#allocation8], %s1000_s30 }
  0x59   : > { %s1010_s29 = scalar_lea.vmem [#allocation7], %s547_s9 }
  0x5a   : > { %790 = dma.done.wait (%p1123_p3), %s236_s21, 32  }
  0x5b   : > { %792 = vsyncadd (%p1123_p3), %s236_s21, 4294967264  ;;  %v829_v0 = vmov 0.0   ;;  %v279_v1 = vld [vmem:[%s230_s5] sm:$0x3]  ;;  %v548_v2 = vld [vmem:[%s230_s5 + $0x2] sm:$0x3] }
  0x5c   : > { %276 = vst [vmem:[#allocation2] sm:$0x3] %v829_v0  ;;  %277 = vst [vmem:[#allocation3] sm:$0x3] %v829_v0  ;;  %v549_v3 = vld [vmem:[%s230_s5 + $0x4] sm:$0x3]  ;;  %v282_v4 = vmax.f32 %v279_v1, %v548_v2 }
  0x5d   : > { %v550_v5 = vld [vmem:[%s230_s5 + $0x6] sm:$0x3]  ;;  %v278_v28 = vld [vmem:[%s1010_s29] sm:$0x3]  ;;  %vm343_vm4 = vcmask 1041408   ;;  %s551_s24 = sshll.u32 %s815_s15, 4 }
  0x5e   : > { %v285_v6 = vmax.f32 %v282_v4, %v549_v3  ;;  %vm308_vm0 = vcmp.eq.s32.totalorder %v278_v28, 0  ;;  %vm313_vm1 = vcmp.eq.s32.totalorder %v278_v28, 1  ;;  %vm320_vm2 = vcmp.eq.s32.totalorder %v278_v28, 2  ;;  %s263_s4 = scalar_lea.vmem [#allocation9], %s1000_s30  ;;  %s269_s7 = scalar_lea.vmem [#allocation10], %s1000_s30 }
  0x5f   : > { %vm327_vm3 = vcmp.eq.s32.totalorder %v278_v28, 3  ;;  %s387_s6 = sshll.u32 %s263_s4, 4  ;;  %s401_s11 = sshll.u32 %s269_s7, 4  ;;  %s1029_s6 = int_to_ptr.vmem [resolvable:$true] %s387_s6  ;;  %s1031_s11 = int_to_ptr.vmem [resolvable:$true] %s401_s11 }
  0x60   : > { %v288_v7 = vmax.f32 %v285_v6, %v550_v5  ;;  %s1027_s18 = scalar_lea.hbm %s1111_s2, %s551_s24  ;;  %s370_s23 = scalar_lea.sflag [#allocation6], %s1000_s30 }
  0x61   : > { %s705_s8 = scalar_lea.vmem %s1029_s6, 16  ;;  %p1124_p0 = scmp.ne.s32.totalorder %s1117_s25, 0 }
  0x62   : > { %v289_v8 = vsub.f32 %v279_v1, %v288_v7  ;;  %v292_v9 = vsub.f32 %v548_v2, %v288_v7  ;;  %v295_v10 = vsub.f32 %v549_v3, %v288_v7  ;;  %v298_v11 = vsub.f32 %v550_v5, %v288_v7  ;;  %p706_p8 = scmp.ne.s32.totalorder %s1029_s6, %s705_s8  ;;  %s830_s10 = smov [#allocation9]  }
  0x63   : > { %v331_v44 = vld [vmem:[#allocation2] sm:$0x3]  ;;  %v335_v47 = vld [vmem:[#allocation3] sm:$0x3]  ;;  %s709_s5 = sshll.u32 %s830_s10, 4  ;;  %s710_s5 = int_to_ptr.vmem [resolvable:$false] %s709_s5 }
  0x64   : > { %v290_v12 = vmul.f32 1.442695, %v289_v8  ;;  %v293_v13 = vmul.f32 1.442695, %v292_v9  ;;  %v296_v14 = vmul.f32 1.442695, %v295_v10  ;;  %p707_p11 = pnand %p706_p8, %p1124_p0  ;;  %p712_p7 = scmp.lt.s32.totalorder %s1029_s6, %s710_s5 }
  0x65   : > { %v299_v15 = vmul.f32 1.442695, %v298_v11  ;;  %s711_s9 = scalar_lea.vmem %s710_s5, 32 }
  0x66   : > { %635 = vpow2.f32 %v290_v12  ;;  %p708_p4 = pneg %p707_p11  ;;  %p713_p10 = scmp.lt.s32.totalorder %s711_s9, %s705_s8 }
  0x67   : > { %637 = vpow2.f32 %v293_v13 }
  0x68   : > { %639 = vpow2.f32 %v296_v14  ;;  %p714_p12 = por %p713_p10, %p712_p7 }
  0x69   : > { %641 = vpow2.f32 %v299_v15 }
  0x6a   : > { %p715_p9 = pnand %p714_p12, %p708_p4 }
  0x70   : > { %v636_v16 = vpop.eup %635 }
  0x71   : > { %v638_v17 = vpop.eup %637 }
  0x72   : > { %v640_v18 = vpop.eup %639  ;;  %v301_v19 = vadd.f32 %v638_v17, %v636_v16 }
  0x73   : > { %v642_v20 = vpop.eup %641 }
  0x74   : > { %v302_v21 = vadd.f32 %v640_v18, %v301_v19 }
  0x76   : > { %v303_v22 = vadd.f32 %v642_v20, %v302_v21 }
  0x78   : > { %643 = vrcp.f32 %v303_v22 }
  0x82   : > { %v644_v23 = vpop.eup %643 }
  0x83   : > { %v305_v24 = vmul.f32 %v644_v23, %v636_v16  ;;  %v310_v25 = vmul.f32 %v644_v23, %v638_v17  ;;  %v317_v26 = vmul.f32 %v644_v23, %v640_v18  ;;  %v324_v27 = vmul.f32 %v644_v23, %v642_v20 }
  0x85   : > { %v306_v29 = vsub.f32 1.0, %v305_v24  ;;  %v311_v30 = vsub.f32 1.0, %v310_v25  ;;  %v318_v31 = vsub.f32 1.0, %v317_v26  ;;  %v325_v32 = vsub.f32 1.0, %v324_v27 }
  0x87   : > { %v307_v33 = vmul.f32 %v306_v29, %v305_v24  ;;  %v312_v34 = vmul.f32 %v311_v30, %v310_v25  ;;  %v319_v35 = vmul.f32 %v318_v31, %v317_v26  ;;  %v326_v36 = vmul.f32 %v325_v32, %v324_v27 }
  0x89   : > { %v315_v37 = vadd.f32 %v312_v34, %v307_v33  ;;  %v309_v38 = vsel %vm308_vm0, %v307_v33, 0.0  ;;  %v314_v39 = vsel %vm313_vm1, %v312_v34, 0.0  ;;  %v321_v40 = vsel %vm320_vm2, %v319_v35, 0.0 }
  0x8a   : > { %v316_v41 = vadd.f32 %v314_v39, %v309_v38  ;;  %v328_v43 = vsel %vm327_vm3, %v326_v36, 0.0 }
  0x8b   : > { %v322_v42 = vadd.f32 %v319_v35, %v315_v37 }
  0x8c   : > { %v323_v45 = vadd.f32 %v321_v40, %v316_v41 }
  0x8d   : > { %v329_v46 = vadd.f32 %v326_v36, %v322_v42 }
  0x8e   : > { %v330_v48 = vadd.f32 %v328_v43, %v323_v45 }
  0x8f   : > { %v333_v49 = vadd.f32 %v331_v44, %v329_v46 }
  0x90   : > { %v337_v50 = vadd.f32 %v335_v47, %v330_v48 }
  0x91   : > { %334 = vst [vmem:[#allocation2] sm:$0x3] %v333_v49 }
  0x92   : > { %338 = vst [vmem:[#allocation3] sm:$0x3] %v337_v50 }
  0x98   : > { %v342_v51 = vld [vmem:[#allocation2] sm:$0x3] }
  0x99   : > { %v344_v52 = vsel %vm343_vm4, %v342_v51, 0.0  ;;  %v356_v53 = vld [vmem:[#allocation3] sm:$0x3] }
  0x9a   : > { %345 = vadd.xlane.f32.xlu0 %v344_v52  ;;  %v357_v54 = vsel %vm343_vm4, %v356_v53, 0.0 }
  0x9e   : > { %358 = vadd.xlane.f32.xlu0 %v357_v54 }
 0x127   : > { %v346_v55 = vpop.xlane.xlu0 %345 }
 0x128   : > { %v347_v56 = vrot.slane %v346_v55, 4 }
 0x12a   : > { %v348_v57 = vadd.f32 %v347_v56, %v346_v55 }
 0x12b   : > { %v359_v58 = vpop.xlane.xlu0 %358 }
 0x12c   : > { %v349_v59 = vrot.slane %v348_v57, 2  ;;  %v360_v60 = vrot.slane %v359_v58, 4 }
 0x12e   : > { %v361_v61 = vadd.f32 %v360_v60, %v359_v58  ;;  %v350_v62 = vadd.f32 %v349_v59, %v348_v57 }
 0x130   : > { %v362_v63 = vrot.slane %v361_v61, 2  ;;  %v351_v0 = vrot.slane %v350_v62, 1 }
 0x132   : > { %v363_v1 = vadd.f32 %v362_v63, %v361_v61  ;;  %v352_v2 = vadd.f32 %v351_v0, %v350_v62 }
 0x134   : > { %556 = vpush %v352_v2  ;;  %v364_v3 = vrot.slane %v363_v1, 1 }
 0x136   : > { %v365_v4 = vadd.f32 %v364_v3, %v363_v1 }
 0x138   : > { %558 = vpush %v365_v4 }
 0x165   : > { %s557_s22 = spop %556 }
 0x166   : > { %v354_v5 = vstv %s557_s22 }
 0x167   : > { %355 = vst [vmem:[%s263_s4] sm:$0x1] %v354_v5 }
 0x168   : > { %718 = shalt.err (!%p715_p9)
}
 0x169   : > { %s719_s21 = scalar_lea.hbm %s1027_s18, 16  ;;  %s723_s19 = scalar_lea.hbm %s1111_s2, 32 }
 0x16a   : > { %p720_p1 = scmp.ne.s32.totalorder %s1027_s18, %s719_s21  ;;  %p724_p5 = scmp.lt.u32.totalorder %s1027_s18, %s1111_s2 }
 0x16b   : > { %p725_p13 = scmp.lt.u32.totalorder %s723_s19, %s719_s21  ;;  %p727_p8 = scmp.lt.u32.totalorder %s719_s21, %s1027_s18 }
 0x16c   : > { %p721_p6 = pnand %p720_p1, %p1124_p0 }
 0x16d   : > { %p726_p3 = por %p725_p13, %p724_p5 }
 0x16e   : > { %p722_p2 = pneg %p721_p6 }
 0x16f   : > { %p728_p11 = por %p727_p8, %p726_p3 }
 0x171   : > { %p729_p4 = pnand %p728_p11, %p722_p2 }
 0x173   : > { %732 = shalt.err (!%p729_p4)
}
 0x174   : > { %564 = dma.vmem_to_hbm [thread:$0]  (%p1124_p0), %s1029_s6, 16, %s1027_s18, %s370_s23  }
 0x175   : > { %s559_s8 = spop %558  ;;  %s1060_s9 = scalar_lea.hbm %s1112_s3, %s551_s24 }
 0x176   : > { %v367_v6 = vstv %s559_s8  ;;  %s374_s21 = scalar_lea.sflag [#allocation11], %s1000_s30  ;;  %s733_s29 = scalar_lea.vmem %s1031_s11, 16 }
 0x177   : > { %368 = vst [vmem:[%s269_s7] sm:$0x1] %v367_v6  ;;  %p734_p7 = scmp.ne.s32.totalorder %s1031_s11, %s733_s29  ;;  %s831_s4 = smov [#allocation10]  }
 0x178   : > { %s737_s19 = sshll.u32 %s831_s4, 4  ;;  %s738_s19 = int_to_ptr.vmem [resolvable:$false] %s737_s19 }
 0x179   : > { %p735_p10 = pnand %p734_p7, %p1124_p0  ;;  %s739_s6 = scalar_lea.vmem %s738_s19, 32 }
 0x17a   : > { %p740_p9 = scmp.lt.s32.totalorder %s1031_s11, %s738_s19  ;;  %p741_p1 = scmp.lt.s32.totalorder %s739_s6, %s733_s29 }
 0x17b   : > { %p736_p12 = pneg %p735_p10 }
 0x17c   : > { %p742_p6 = por %p741_p1, %p740_p9 }
 0x17e   : > { %p743_p2 = pnand %p742_p6, %p736_p12 }
 0x180   : > { %746 = shalt.err (!%p743_p2)
}
 0x181   : > { %s747_s15 = scalar_lea.hbm %s1060_s9, 16  ;;  %s751_s7 = scalar_lea.hbm %s1112_s3, 32 }
 0x182   : > { %p748_p5 = scmp.ne.s32.totalorder %s1060_s9, %s747_s15  ;;  %p752_p8 = scmp.lt.u32.totalorder %s1060_s9, %s1112_s3 }
 0x183   : > { %p753_p11 = scmp.lt.u32.totalorder %s751_s7, %s747_s15  ;;  %p755_p7 = scmp.lt.u32.totalorder %s747_s15, %s1060_s9 }
 0x184   : > { %p749_p13 = pnand %p748_p5, %p1124_p0 }
 0x185   : > { %p754_p4 = por %p753_p11, %p752_p8 }
 0x186   : > { %p750_p3 = pneg %p749_p13 }
 0x187   : > { %p756_p10 = por %p755_p7, %p754_p4 }
 0x189   : > { %p757_p12 = pnand %p756_p10, %p750_p3 }
 0x18b   : > { %760 = shalt.err (!%p757_p12)
}
 0x18c   : > { %565 = dma.vmem_to_hbm [thread:$0]  (%p1124_p0), %s1031_s11, 16, %s1060_s9, %s374_s21  }
 0x18d PF: > { %s413_s28 = sand.u32 1, %s803_s12   ;;  %p1125_p9 = scmp.ne.s32.totalorder %s1118_s27, 0 }
 0x18e   : > { %p1126_p1 = scmp.ge.s32.totalorder %s823_s17, 2  ;;  %s414_s22 = scalar_lea.sflag [#allocation6], %s413_s28 }
 0x190   : > { %p576_p6 = pnand %p1126_p1, %p1125_p9 }
 0x192   : > { %794 = dma.done.wait (!%p576_p6), %s414_s22, 16  }
 0x193   : > { %796 = vsyncadd (!%p576_p6), %s414_s22, 4294967280  ;;  %s422_s8 = scalar_lea.sflag [#allocation11], %s413_s28 }
 0x194   : > { %798 = dma.done.wait (!%p576_p6), %s422_s8, 16  }
 0x195   : > { %800 = vsyncadd (!%p576_p6), %s422_s8, 4294967280  ;;  %s26_s17 = sadd.s32 1, %s823_s17   ;;  %s1127_s12 = smov %s807_s13 }
 0x196   : > { %p23_p2 = scmp.ge.s32.totalorder %s26_s17, 4   ;;  %s1128_s13 = smov %s811_s14 }
 0x197   : > { %s1129_s14 = smov %s908_s26  ;;  %s1130_s15 = smov %s819_s16 }
 0x198   : > { %s1131_s16 = smov %s1133_s20  ;;  %25 = sbr.rel (!%p23_p2) target bundleno = 10 (0xa), region = 114 }
 0x19f   :  { %426 = vsyncpa [#allocation5], 1 }
 0x1a0   :  { %428 = vsyncpa [#allocation5 + $0x1], 1 }
 0x1a1   :  { %429 = vsyncpa [#allocation8], 1 }
 0x1a2   :  { %431 = vsyncpa [#allocation8 + $0x1], 1 }
 0x1a3   :  { %432 = vsyncpa [#allocation6], 1 }
 0x1a4   :  { %434 = vsyncpa [#allocation6 + $0x1], 1 }
 0x1a5   :  { %435 = vsyncpa [#allocation11], 1 }
 0x1a6   :  { %437 = vsyncpa [#allocation11 + $0x1], 1 }

</bundles_post_ra>
